<compile_context>
chip_gen: v5e
topology: v5e:2x2
jax: 0.10.0
libtpu: 0.0.40
codegen_flags: <defaults>
</compile_context>

<pallas_src>
import jax
import jax.numpy as jnp
from jax.experimental import pallas as pl
from jax.experimental.pallas import tpu as pltpu

LANE = 128
SUBLANE = 8
VMEM_LIMIT_BYTES = 32 * 1024 * 1024  # generous; actual footprint here is <1 MiB


def _round_up(x, m):
    return ((x + m - 1) // m) * m


# ---------------------------------------------------------------------------
# One-time parameter prep (NOT on the per-step path).
# ---------------------------------------------------------------------------
def prepare_params(w_i2h, b_i2h, w_i2o, b_i2o, input_size):
    """Pack + pad the two PyTorch-layout Linears into lane-aligned weights.

    w_i2h: (H, I+H), w_i2o: (O, I+H)   (PyTorch nn.Linear layout)

    Packed / padded column layout (each field a multiple of 128 lanes):
      columns [0,  Hp)     : hidden head (real cols [0, H))
      columns [Hp, Hp+Op)  : output head (real cols [Hp, Hp+O))

    Returns dict with:
      wx: (Ip, Hp+Op)  rows multiplying x       (zero padded)
      wh: (Hp, Hp+Op)  rows multiplying hidden  (zero padded)
      b : (1,  Hp+Op)  packed bias              (zero padded)
    Zero padding keeps the recurrence exact: padded hidden lanes always
    multiply all-zero rows of wh, so they never leak into real columns.
    """
    H, fan_in = w_i2h.shape
    O = w_i2o.shape[0]
    I = input_size
    assert fan_in == I + H

    Ip = _round_up(I, LANE)
    Hp = _round_up(H, LANE)
    Op = _round_up(O, LANE)
    HOp = Hp + Op

    wx = jnp.zeros((Ip, HOp), jnp.float32)
    wx = wx.at[:I, :H].set(w_i2h[:, :I].T)
    wx = wx.at[:I, Hp:Hp + O].set(w_i2o[:, :I].T)

    wh = jnp.zeros((Hp, HOp), jnp.float32)
    wh = wh.at[:H, :H].set(w_i2h[:, I:].T)
    wh = wh.at[:H, Hp:Hp + O].set(w_i2o[:, I:].T)

    b = jnp.zeros((1, HOp), jnp.float32)
    b = b.at[0, :H].set(b_i2h)
    b = b.at[0, Hp:Hp + O].set(b_i2o)

    return dict(wx=wx, wh=wh, b=b,
                I=I, H=H, O=O, Ip=Ip, Hp=Hp, Op=Op, HOp=HOp)


# ---------------------------------------------------------------------------
# Single-step kernel (matches RNN.forward exactly).
# ---------------------------------------------------------------------------
def _rnn_cell_kernel(x_ref, h_ref, wx_ref, wh_ref, b_ref, packed_ref):
    lin = (jnp.dot(x_ref[...], wx_ref[...], preferred_element_type=jnp.float32)
           + jnp.dot(h_ref[...], wh_ref[...], preferred_element_type=jnp.float32)
           + b_ref[...])
    packed_ref[...] = jax.nn.sigmoid(lin).astype(packed_ref.dtype)


def rnn_forward(x, h, params):
    """Pallas-backed single-step forward.  Returns (output, hidden_new)."""
    B = x.shape[0]
    I, H, O = params["I"], params["H"], params["O"]
    Ip, Hp, HOp = params["Ip"], params["Hp"], params["HOp"]
    Bp = _round_up(B, SUBLANE)

    x_p = jnp.zeros((Bp, Ip), jnp.float32).at[:B, :I].set(x)
    h_p = jnp.zeros((Bp, Hp), jnp.float32).at[:B, :H].set(h)

    packed = pl.pallas_call(
        _rnn_cell_kernel,
        out_shape=jax.ShapeDtypeStruct((Bp, HOp), jnp.float32),
        in_specs=[
            pl.BlockSpec((Bp, Ip), lambda: (0, 0)),
            pl.BlockSpec((Bp, Hp), lambda: (0, 0)),
            pl.BlockSpec((Ip, HOp), lambda: (0, 0)),
            pl.BlockSpec((Hp, HOp), lambda: (0, 0)),
            pl.BlockSpec((1, HOp), lambda: (0, 0)),
        ],
        out_specs=pl.BlockSpec((Bp, HOp), lambda: (0, 0)),
        compiler_params=pltpu.CompilerParams(
            vmem_limit_bytes=VMEM_LIMIT_BYTES),
    )(x_p, h_p, params["wx"], params["wh"], params["b"])

    output = packed[:B, Hp:Hp + O]
    hidden_new = packed[:B, :H]
    return output, hidden_new


# ---------------------------------------------------------------------------
# Fused sequence, stage 1: fully-parallel x-projection (bias folded in).
# ---------------------------------------------------------------------------
def _x_proj_kernel(x_ref, wx_ref, b_ref, pre_ref):
    pre_ref[...] = (
        jnp.dot(x_ref[...], wx_ref[...], preferred_element_type=jnp.float32)
        + b_ref[...]).astype(pre_ref.dtype)


# ---------------------------------------------------------------------------
# Fused sequence, stage 2: serial recurrence, TT timesteps per grid step.
# ---------------------------------------------------------------------------
def _rnn_recur_kernel(pre_ref, h0_ref, wh_ref, packed_ref, h_scr):
    @pl.when(pl.program_id(0) == 0)
    def _():
        h_scr[...] = h0_ref[...].astype(h_scr.dtype)

    TT = pre_ref.shape[0]
    Hp = h_scr.shape[1]

    def step(tt, carry):
        # Serial per-step work: one (Bp,Hp)x(Hp,HOp) dot + sigmoid.
        lin = pre_ref[tt] + jnp.dot(h_scr[...], wh_ref[...],
                                    preferred_element_type=jnp.float32)
        act = jax.nn.sigmoid(lin)                       # (Bp, HOp)
        packed_ref[tt] = act.astype(packed_ref.dtype)
        # Hp is a multiple of 128 -> whole-tile slice, no masking on the
        # serial path.
        h_scr[...] = act[:, :Hp].astype(h_scr.dtype)
        return carry

    jax.lax.fori_loop(0, TT, step, 0, unroll=True)


def rnn_forward_sequence(xs, h0, params, tt=8):
    """Run T timesteps with the x-projection hoisted off the serial path.

    xs: (T, B, I), h0: (B, H).
    Returns (outputs (T, B, O), final hidden (B, H)).
    """
    T, B, I = xs.shape
    H, O = params["H"], params["O"]
    Ip, Hp, HOp = params["Ip"], params["Hp"], params["HOp"]
    Bp = _round_up(B, SUBLANE)
    TT = min(tt, T)
    Tp = _round_up(T, TT)
    n_chunks = Tp // TT
    rows = TT * Bp

    xs_p = jnp.zeros((Tp, Bp, Ip), jnp.float32).at[:T, :B, :I].set(xs)
    h0_p = jnp.zeros((Bp, Hp), jnp.float32).at[:B, :H].set(h0)

    # ---- stage 1: pre[t] = x[t] @ Wx + b  (parallel, MXU-friendly) ---------
    xs2 = xs_p.reshape(Tp * Bp, Ip)
    pre2 = pl.pallas_call(
        _x_proj_kernel,
        out_shape=jax.ShapeDtypeStruct((Tp * Bp, HOp), jnp.float32),
        grid_spec=pltpu.PrefetchScalarGridSpec(
            num_scalar_prefetch=0,
            grid=(n_chunks,),
            in_specs=[
                pl.BlockSpec((rows, Ip), lambda r: (r, 0)),
                pl.BlockSpec((Ip, HOp), lambda r: (0, 0)),
                pl.BlockSpec((1, HOp), lambda r: (0, 0)),
            ],
            out_specs=pl.BlockSpec((rows, HOp), lambda r: (r, 0)),
        ),
        compiler_params=pltpu.CompilerParams(
            dimension_semantics=("parallel",),
            vmem_limit_bytes=VMEM_LIMIT_BYTES),
    )(xs2, params["wx"], params["b"])
    pre = pre2.reshape(Tp, Bp, HOp)

    # ---- stage 2: serial recurrence, hidden carried in VMEM scratch --------
    packed = pl.pallas_call(
        _rnn_recur_kernel,
        out_shape=jax.ShapeDtypeStruct((Tp, Bp, HOp), jnp.float32),
        grid_spec=pltpu.PrefetchScalarGridSpec(
            num_scalar_prefetch=0,
            grid=(n_chunks,),
            in_specs=[
                pl.BlockSpec((TT, Bp, HOp), lambda c: (c, 0, 0)),  # pre chunk
                pl.BlockSpec((Bp, Hp), lambda c: (0, 0)),          # h0
                pl.BlockSpec((Hp, HOp), lambda c: (0, 0)),         # Wh resident
            ],
            out_specs=pl.BlockSpec((TT, Bp, HOp), lambda c: (c, 0, 0)),
            scratch_shapes=[pltpu.VMEM((Bp, Hp), jnp.float32)],
        ),
        compiler_params=pltpu.CompilerParams(
            dimension_semantics=("arbitrary",),   # true recurrence => sequential
            vmem_limit_bytes=VMEM_LIMIT_BYTES),
    )(pre, h0_p, params["wh"])

    outputs = packed[:T, :B, Hp:Hp + O]
    hidden_final = packed[T - 1, :B, :H]
    return outputs, hidden_final


# ---------------------------------------------------------------------------
# nn.Linear-style deterministic init (uniform +-1/sqrt(fan_in)).
# ---------------------------------------------------------------------------
def init_params(key, input_size, hidden_size, output_size):
    fan_in = input_size + hidden_size
    bound = 1.0 / jnp.sqrt(jnp.float32(fan_in))
    k1, k2, k3, k4 = jax.random.split(key, 4)
    w_i2h = jax.random.uniform(k1, (hidden_size, fan_in), jnp.float32,
                               -bound, bound)
    b_i2h = jax.random.uniform(k2, (hidden_size,), jnp.float32, -bound, bound)
    w_i2o = jax.random.uniform(k3, (output_size, fan_in), jnp.float32,
                               -bound, bound)
    b_i2o = jax.random.uniform(k4, (output_size,), jnp.float32, -bound, bound)
    return w_i2h, b_i2h, w_i2o, b_i2o


if __name__ == "__main__":
    batch = 2
    input_size = 4
    hidden_size = 32
    output_size = 8
    seq_len = 16
    time_chunk = 8

    key = jax.random.PRNGKey(0)
    kx, kp, ks = jax.random.split(key, 3)

    w_i2h, b_i2h, w_i2o, b_i2o = init_params(
        kp, input_size, hidden_size, output_size)
    params = prepare_params(w_i2h, b_i2h, w_i2o, b_i2o, input_size)

    # --- single-step forward (RNN.forward semantics) -----------------------
    x = jax.random.normal(kx, (batch, input_size), jnp.float32)
    h0 = jnp.zeros((batch, hidden_size), jnp.float32)   # RNN.initHidden(batch)

    out, h1 = rnn_forward(x, h0, params)
    jax.block_until_ready((out, h1))

    combined = jnp.concatenate([x, h0], axis=1)
    ref_h = jax.nn.sigmoid(combined @ w_i2h.T + b_i2h)
    ref_o = jax.nn.sigmoid(combined @ w_i2o.T + b_i2o)
    assert out.shape == (batch, output_size)
    assert h1.shape == (batch, hidden_size)
    assert jnp.allclose(out, ref_o, atol=1e-5), "single-step output mismatch"
    assert jnp.allclose(h1, ref_h, atol=1e-5), "single-step hidden mismatch"

    # --- fused sequence: parallel x-projection + chunked serial recurrence --
    xs = jax.random.normal(ks, (seq_len, batch, input_size), jnp.float32)
    outs, h_final = rnn_forward_sequence(xs, h0, params, tt=time_chunk)
    jax.block_until_ready((outs, h_final))

    h_ref = h0
    ref_outs = []
    for t in range(seq_len):
        c = jnp.concatenate([xs[t], h_ref], axis=1)
        ref_outs.append(jax.nn.sigmoid(c @ w_i2o.T + b_i2o))
        h_ref = jax.nn.sigmoid(c @ w_i2h.T + b_i2h)
    ref_outs = jnp.stack(ref_outs)
    assert outs.shape == (seq_len, batch, output_size)
    assert h_final.shape == (batch, hidden_size)
    assert jnp.allclose(outs, ref_outs, atol=1e-4), "sequence output mismatch"
    assert jnp.allclose(h_final, h_ref, atol=1e-4), "sequence hidden mismatch"

    print("KERNEL_OK")
</pallas_src>

<mosaic_0001>
module attributes {stable_mosaic.version = 11 : i64} {
  func.func @_rnn_cell_kernel(%arg0: memref<8x128xf32, #tpu.memory_space<vmem>>, %arg1: memref<8x128xf32, #tpu.memory_space<vmem>>, %arg2: memref<128x256xf32, #tpu.memory_space<vmem>>, %arg3: memref<128x256xf32, #tpu.memory_space<vmem>>, %arg4: memref<1x256xf32, #tpu.memory_space<vmem>>, %arg5: memref<8x256xf32, #tpu.memory_space<vmem>>) attributes {dimension_semantics = [], scalar_prefetch = 0 : i64, scratch_operands = 0 : i64, tpu.core_type = #tpu.core_type<tc>} {
    %c0 = arith.constant 0 : index
    %c0_0 = arith.constant 0 : index
    %0 = vector.load %arg0[%c0, %c0_0] : memref<8x128xf32, #tpu.memory_space<vmem>>, vector<8x128xf32>
    %c0_1 = arith.constant 0 : index
    %c0_2 = arith.constant 0 : index
    %1 = vector.load %arg2[%c0_1, %c0_2] : memref<128x256xf32, #tpu.memory_space<vmem>>, vector<128x256xf32>
    %cst = arith.constant dense<0.000000e+00> : vector<8x256xf32>
    %2 = tpu.matmul %0, %1, %cst {dimension_numbers = #tpu.dot_dimension_numbers<[1], [0], [0], [1], [0, 0, 1, 1], [], []>} : vector<8x128xf32>, vector<128x256xf32>, vector<8x256xf32> -> vector<8x256xf32>
    %c0_3 = arith.constant 0 : index
    %c0_4 = arith.constant 0 : index
    %3 = vector.load %arg1[%c0_3, %c0_4] : memref<8x128xf32, #tpu.memory_space<vmem>>, vector<8x128xf32>
    %c0_5 = arith.constant 0 : index
    %c0_6 = arith.constant 0 : index
    %4 = vector.load %arg3[%c0_5, %c0_6] : memref<128x256xf32, #tpu.memory_space<vmem>>, vector<128x256xf32>
    %cst_7 = arith.constant dense<0.000000e+00> : vector<8x256xf32>
    %5 = tpu.matmul %3, %4, %cst_7 {dimension_numbers = #tpu.dot_dimension_numbers<[1], [0], [0], [1], [0, 0, 1, 1], [], []>} : vector<8x128xf32>, vector<128x256xf32>, vector<8x256xf32> -> vector<8x256xf32>
    %6 = arith.addf %2, %5 : vector<8x256xf32>
    %c0_8 = arith.constant 0 : index
    %c0_9 = arith.constant 0 : index
    %7 = vector.load %arg4[%c0_8, %c0_9] : memref<1x256xf32, #tpu.memory_space<vmem>>, vector<1x256xf32>
    %8 = vector.broadcast %7 : vector<1x256xf32> to vector<8x256xf32>
    %9 = arith.addf %6, %8 : vector<8x256xf32>
    %10 = arith.negf %9 : vector<8x256xf32>
    %11 = math.exp %10 : vector<8x256xf32>
    %cst_10 = arith.constant 1.000000e+00 : f32
    %12 = vector.broadcast %cst_10 : f32 to vector<8x256xf32>
    %13 = arith.addf %12, %11 : vector<8x256xf32>
    %14 = arith.divf %12, %13 : vector<8x256xf32>
    %c0_11 = arith.constant 0 : index
    %c0_12 = arith.constant 0 : index
    %15 = vector.load %arg5[%c0_11, %c0_12] : memref<8x256xf32, #tpu.memory_space<vmem>>, vector<8x256xf32>
    tpu.vector_store %arg5[%c0_11, %c0_12], %14 {strides = array<i32>} : memref<8x256xf32, #tpu.memory_space<vmem>>, vector<8x256xf32>,
    return
  }
}

</mosaic_0001>

<bundles_post_ra>
// kernel: tpu_custom_call.1
= control target key start
LH: loop header
LB: loop body
LE: loop exit
PB: predicated region body
PF: predicated region fallthrough
CT: control target
= control target key end

     0   :  { %10 = vsyncpa [#allocation3], 0  ;;  %s493_s0 = inlined_call_operand.hbm [shape: f32[8,128], index: 0, kind: input, shape index: {}]   ;;  %s494_s1 = inlined_call_operand.hbm [shape: f32[8,128], index: 1, kind: input, shape index: {}]   ;;  %s495_s2 = inlined_call_operand.hbm [shape: f32[128,256], index: 2, kind: input, shape index: {}]   ;;  %s496_s3 = inlined_call_operand.hbm [shape: f32[128,256], index: 3, kind: input, shape index: {}]   ;;  %s497_s4 = inlined_call_operand.vmem [shape: f32[1,256], index: 4, kind: input, shape index: {}]   ;;  %s498_s5 = inlined_call_operand.hbm [shape: f32[8,256], index: 5, kind: output, shape index: {}]  }
   0x1   :  { %11 = vsyncpa [#allocation6], 0 }
   0x2   :  { %12 = vsyncpa [#allocation9], 0  ;;  %s30_s20 = sshll.u32 %s494_s1, 4  ;;  %s31_s20 = int_to_ptr.hbm [resolvable:$true] %s30_s20 }
   0x3   :  { %13 = vsyncpa [#allocation4], 0  ;;  %s438_s21 = smov [#allocation5]   ;;  %s19_s25 = sshll.u32 %s493_s0, 4  ;;  %s20_s25 = int_to_ptr.hbm [resolvable:$true] %s19_s25 }
   0x4   :  { %s32_s22 = sshll.u32 %s438_s21, 4  ;;  %s439_s26 = smov [#allocation2]   ;;  %s33_s22 = int_to_ptr.vmem [resolvable:$true] %s32_s22 }
   0x5   :  { %35 = dma.hbm_to_vmem [thread:$0]  %s31_s20, 128, %s33_s22, [#allocation6]  }
   0x6   :  { %s21_s27 = sshll.u32 %s439_s26, 4  ;;  %s40_s30 = sshll.u32 %s495_s2, 4  ;;  %s22_s27 = int_to_ptr.vmem [resolvable:$true] %s21_s27  ;;  %s41_s30 = int_to_ptr.hbm [resolvable:$true] %s40_s30 }
   0x7   :  { %24 = dma.hbm_to_vmem [thread:$0]  %s20_s25, 128, %s22_s27, [#allocation3]  }
   0x8   :  { %s440_s1 = smov [#allocation7]   ;;  %s53_s9 = sshll.u32 %s496_s3, 4  ;;  %s54_s9 = int_to_ptr.hbm [resolvable:$true] %s53_s9 }
   0x9   :  { %s42_s6 = sshll.u32 %s440_s1, 4  ;;  %s441_s10 = smov 256   ;;  %s43_s6 = int_to_ptr.vmem [resolvable:$true] %s42_s6 }
   0xa   :  { %s442_s0 = smov 16   ;;  %s443_s11 = smov [#allocation8]  }
   0xb   :  { %48 = dma.hbm_to_vmem [thread:$0]  %s41_s30, 4096, %s43_s6, [#allocation6], %s441_s10, %s441_s10, %s442_s0  }
   0xc   :  { %s55_s12 = sshll.u32 %s443_s11, 4  ;;  %s56_s12 = int_to_ptr.vmem [resolvable:$true] %s55_s12 }
   0xd   :  { %61 = dma.hbm_to_vmem [thread:$0]  %s54_s9, 4096, %s56_s12, [#allocation9], %s441_s10, %s441_s10, %s442_s0  }
   0xe   :  { %430 = dma.done.wait [#allocation3], 128  }
   0xf   :  { %431 = vsyncadd [#allocation3], 4294967168 }
  0x10   :  { %432 = dma.done.wait [#allocation6], 4224  }
  0x11   :  { %433 = vsyncadd [#allocation6], 4294963072 }
  0x12   :  { %434 = dma.done.wait [#allocation9], 4096  }
  0x13   :  { %435 = vsyncadd [#allocation9], 4294963200  ;;  %v111_v0 = vld [vmem:[#allocation7 + $0xf0] sm:$0xff]  ;;  %v112_v1 = vld [vmem:[#allocation7 + $0xf8] sm:$0xff]  ;;  %s281_s16 = sshll.u32 %s498_s5, 4  ;;  %s282_s16 = int_to_ptr.hbm [resolvable:$true] %s281_s16 }
  0x14   :  { %v109_v2 = vld [vmem:[#allocation7 + $0xe0] sm:$0xff]  ;;  %186 = vmatpush.msra.mxu2 %v111_v0  ;;  %206 = vmatpush.msra.mxu3 %v112_v1  ;;  %v110_v3 = vld [vmem:[#allocation7 + $0xe8] sm:$0xff]  ;;  %v107_v4 = vld [vmem:[#allocation7 + $0xd0] sm:$0xff] }
  0x15   :  { %v108_v5 = vld [vmem:[#allocation7 + $0xd8] sm:$0xff]  ;;  %v144_v6 = vld [vmem:[#allocation8 + $0xf0] sm:$0xff]  ;;  %v142_v8 = vld [vmem:[#allocation8 + $0xe0] sm:$0xff] }
  0x16   :  { %v145_v7 = vld [vmem:[#allocation8 + $0xf8] sm:$0xff]  ;;  %187 = vmatpush.msra.mxu2 %v109_v2  ;;  %207 = vmatpush.msra.mxu3 %v110_v3  ;;  %v143_v9 = vld [vmem:[#allocation8 + $0xe8] sm:$0xff]  ;;  %v105_v10 = vld [vmem:[#allocation7 + $0xc0] sm:$0xff] }
  0x17   :  { %146 = vmatpush.msra.mxu0 %v144_v6  ;;  %166 = vmatpush.msra.mxu1 %v145_v7  ;;  %v106_v11 = vld [vmem:[#allocation7 + $0xc8] sm:$0xff]  ;;  %v140_v12 = vld [vmem:[#allocation8 + $0xd0] sm:$0xff]  ;;  %v141_v13 = vld [vmem:[#allocation8 + $0xd8] sm:$0xff] }
  0x18   :  { %188 = vmatpush.msra.mxu2 %v107_v4  ;;  %208 = vmatpush.msra.mxu3 %v108_v5  ;;  %v103_v14 = vld [vmem:[#allocation7 + $0xb0] sm:$0xff]  ;;  %v104_v15 = vld [vmem:[#allocation7 + $0xb8] sm:$0xff]  ;;  %v138_v16 = vld [vmem:[#allocation8 + $0xc0] sm:$0xff] }
  0x19   :  { %147 = vmatpush.msra.mxu0 %v142_v8  ;;  %167 = vmatpush.msra.mxu1 %v143_v9  ;;  %v139_v17 = vld [vmem:[#allocation8 + $0xc8] sm:$0xff]  ;;  %v101_v18 = vld [vmem:[#allocation7 + $0xa0] sm:$0xff]  ;;  %v136_v20 = vld [vmem:[#allocation8 + $0xb0] sm:$0xff] }
  0x1a   :  { %189 = vmatpush.msra.mxu2 %v105_v10  ;;  %209 = vmatpush.msra.mxu3 %v106_v11  ;;  %v102_v19 = vld [vmem:[#allocation7 + $0xa8] sm:$0xff]  ;;  %v137_v21 = vld [vmem:[#allocation8 + $0xb8] sm:$0xff]  ;;  %v99_v22 = vld [vmem:[#allocation7 + $0x90] sm:$0xff] }
  0x1b   :  { %148 = vmatpush.msra.mxu0 %v140_v12  ;;  %168 = vmatpush.msra.mxu1 %v141_v13  ;;  %v100_v23 = vld [vmem:[#allocation7 + $0x98] sm:$0xff]  ;;  %v134_v24 = vld [vmem:[#allocation8 + $0xa0] sm:$0xff]  ;;  %v135_v25 = vld [vmem:[#allocation8 + $0xa8] sm:$0xff] }
  0x1c   :  { %190 = vmatpush.msra.mxu2 %v103_v14  ;;  %210 = vmatpush.msra.mxu3 %v104_v15  ;;  %v97_v26 = vld [vmem:[#allocation7 + $0x80] sm:$0xff]  ;;  %v98_v27 = vld [vmem:[#allocation7 + $0x88] sm:$0xff]  ;;  %v132_v28 = vld [vmem:[#allocation8 + $0x90] sm:$0xff] }
  0x1d   :  { %149 = vmatpush.msra.mxu0 %v138_v16  ;;  %169 = vmatpush.msra.mxu1 %v139_v17  ;;  %v133_v29 = vld [vmem:[#allocation8 + $0x98] sm:$0xff]  ;;  %v95_v30 = vld [vmem:[#allocation7 + $0x70] sm:$0xff]  ;;  %v130_v32 = vld [vmem:[#allocation8 + $0x80] sm:$0xff] }
  0x1e   :  { %191 = vmatpush.msra.mxu2 %v101_v18  ;;  %211 = vmatpush.msra.mxu3 %v102_v19  ;;  %v96_v31 = vld [vmem:[#allocation7 + $0x78] sm:$0xff]  ;;  %v131_v33 = vld [vmem:[#allocation8 + $0x88] sm:$0xff]  ;;  %v93_v34 = vld [vmem:[#allocation7 + $0x60] sm:$0xff] }
  0x1f   :  { %150 = vmatpush.msra.mxu0 %v136_v20  ;;  %170 = vmatpush.msra.mxu1 %v137_v21  ;;  %v94_v35 = vld [vmem:[#allocation7 + $0x68] sm:$0xff]  ;;  %v128_v36 = vld [vmem:[#allocation8 + $0x70] sm:$0xff]  ;;  %v129_v37 = vld [vmem:[#allocation8 + $0x78] sm:$0xff] }
  0x20   :  { %192 = vmatpush.msra.mxu2 %v99_v22  ;;  %212 = vmatpush.msra.mxu3 %v100_v23  ;;  %v91_v38 = vld [vmem:[#allocation7 + $0x50] sm:$0xff]  ;;  %v92_v39 = vld [vmem:[#allocation7 + $0x58] sm:$0xff]  ;;  %v126_v40 = vld [vmem:[#allocation8 + $0x60] sm:$0xff] }
  0x21   :  { %151 = vmatpush.msra.mxu0 %v134_v24  ;;  %171 = vmatpush.msra.mxu1 %v135_v25  ;;  %v127_v41 = vld [vmem:[#allocation8 + $0x68] sm:$0xff]  ;;  %v89_v42 = vld [vmem:[#allocation7 + $0x40] sm:$0xff]  ;;  %v124_v44 = vld [vmem:[#allocation8 + $0x50] sm:$0xff] }
  0x22   :  { %193 = vmatpush.msra.mxu2 %v97_v26  ;;  %213 = vmatpush.msra.mxu3 %v98_v27  ;;  %v90_v43 = vld [vmem:[#allocation7 + $0x48] sm:$0xff]  ;;  %v125_v45 = vld [vmem:[#allocation8 + $0x58] sm:$0xff]  ;;  %v87_v46 = vld [vmem:[#allocation7 + $0x30] sm:$0xff] }
  0x23   :  { %152 = vmatpush.msra.mxu0 %v132_v28  ;;  %172 = vmatpush.msra.mxu1 %v133_v29  ;;  %v88_v47 = vld [vmem:[#allocation7 + $0x38] sm:$0xff]  ;;  %v122_v48 = vld [vmem:[#allocation8 + $0x40] sm:$0xff]  ;;  %v123_v49 = vld [vmem:[#allocation8 + $0x48] sm:$0xff] }
  0x24   :  { %194 = vmatpush.msra.mxu2 %v95_v30  ;;  %214 = vmatpush.msra.mxu3 %v96_v31  ;;  %v85_v50 = vld [vmem:[#allocation7 + $0x20] sm:$0xff]  ;;  %v86_v51 = vld [vmem:[#allocation7 + $0x28] sm:$0xff]  ;;  %v120_v52 = vld [vmem:[#allocation8 + $0x30] sm:$0xff] }
  0x25   :  { %153 = vmatpush.msra.mxu0 %v130_v32  ;;  %173 = vmatpush.msra.mxu1 %v131_v33  ;;  %v121_v53 = vld [vmem:[#allocation8 + $0x38] sm:$0xff]  ;;  %v83_v54 = vld [vmem:[#allocation7 + $0x10] sm:$0xff]  ;;  %v118_v56 = vld [vmem:[#allocation8 + $0x20] sm:$0xff] }
  0x26   :  { %195 = vmatpush.msra.mxu2 %v93_v34  ;;  %215 = vmatpush.msra.mxu3 %v94_v35  ;;  %v84_v55 = vld [vmem:[#allocation7 + $0x18] sm:$0xff]  ;;  %v119_v57 = vld [vmem:[#allocation8 + $0x28] sm:$0xff]  ;;  %v81_v58 = vld [vmem:[#allocation7] sm:$0xff] }
  0x27   :  { %154 = vmatpush.msra.mxu0 %v128_v36  ;;  %174 = vmatpush.msra.mxu1 %v129_v37  ;;  %v82_v59 = vld [vmem:[#allocation7 + $0x8] sm:$0xff]  ;;  %v80_v60 = vld [vmem:[#allocation2] sm:$0xff]  ;;  %v117_v62 = vld [vmem:[#allocation8 + $0x18] sm:$0xff] }
  0x28   :  { %196 = vmatpush.msra.mxu2 %v91_v38  ;;  %216 = vmatpush.msra.mxu3 %v92_v39  ;;  %v116_v61 = vld [vmem:[#allocation8 + $0x10] sm:$0xff]  ;;  %v114_v63 = vld [vmem:[#allocation8] sm:$0xff]  ;;  %v115_v0 = vld [vmem:[#allocation8 + $0x8] sm:$0xff] }
  0x29   :  { %155 = vmatpush.msra.mxu0 %v126_v40  ;;  %175 = vmatpush.msra.mxu1 %v127_v41  ;;  %v113_v1 = vld [vmem:[#allocation5] sm:$0xff]  ;;  %v226_v2 = vld [vmem:[%s497_s4] sm:$0x3]  ;;  %s444_s4 = smov [#allocation10]  }
  0x2a   :  { %197 = vmatpush.msra.mxu2 %v89_v42  ;;  %217 = vmatpush.msra.mxu3 %v90_v43  ;;  %v228_v5 = vperm.slane %v226_v2, 0  ;;  %v229_v6 = vperm.slane %v226_v2, 1  ;;  %s279_s13 = sshll.u32 %s444_s4, 4  ;;  %s280_s13 = int_to_ptr.vmem [resolvable:$true] %s279_s13 }
  0x2b   :  { %156 = vmatpush.msra.mxu0 %v124_v44  ;;  %176 = vmatpush.msra.mxu1 %v125_v45 }
  0x2c   :  { %198 = vmatpush.msra.mxu2 %v87_v46  ;;  %218 = vmatpush.msra.mxu3 %v88_v47 }
  0x2d   :  { %157 = vmatpush.msra.mxu0 %v122_v48  ;;  %177 = vmatpush.msra.mxu1 %v123_v49 }
  0x2e   :  { %199 = vmatpush.msra.mxu2 %v85_v50  ;;  %219 = vmatpush.msra.mxu3 %v86_v51 }
  0x2f   :  { %158 = vmatpush.msra.mxu0 %v120_v52  ;;  %178 = vmatpush.msra.mxu1 %v121_v53 }
  0x30   :  { %200 = vmatpush.msra.mxu2 %v83_v54  ;;  %220 = vmatpush.msra.mxu3 %v84_v55 }
  0x31   :  { %159 = vmatpush.msra.mxu0 %v118_v56  ;;  %179 = vmatpush.msra.mxu1 %v119_v57 }
  0x32   :  { %201 = vmatpush.msra.mxu2 %v81_v58  ;;  %221 = vmatpush.msra.mxu3 %v82_v59 }
  0x33   :  { %202 = vmatmul.f32.vlgmr.msra.gmra.mxu2 %v80_v60  ;;  %222 = vmatmul.f32.vlgmr.msra.gmra.mxu3 %v80_v60 }
  0x34   :  { %160 = vmatpush.msra.mxu0 %v116_v61  ;;  %180 = vmatpush.msra.mxu1 %v117_v62 }
  0x36   :  { %161 = vmatpush.msra.mxu0 %v114_v63  ;;  %181 = vmatpush.msra.mxu1 %v115_v0 }
  0x37   :  { %162 = vmatmul.f32.vlgmr.msra.gmra.mxu0 %v113_v1  ;;  %182 = vmatmul.f32.vlgmr.msra.gmra.mxu1 %v113_v1 }
  0xb4   :  { %v163_v3 = vpop.f32.mrf.mxu0  ;;  %v183_v4 = vpop.f32.mrf.mxu1 }
  0xb6   :  { %v203_v7 = vpop.f32.mrf.mxu2  ;;  %v223_v8 = vpop.f32.mrf.mxu3 }
  0xb7   :  { %v204_v9 = vadd.f32 %v203_v7, %v163_v3  ;;  %v224_v10 = vadd.f32 %v223_v8, %v183_v4 }
  0xb9   :  { %v232_v11 = vadd.f32 %v228_v5, %v204_v9  ;;  %v233_v12 = vadd.f32 %v229_v6, %v224_v10 }
  0xbb   :  { %v293_v13 = vmul.f32 -1.442695, %v232_v11  ;;  %v294_v14 = vmul.f32 -1.442695, %v233_v12 }
  0xbd   :  { %302 = vpow2.f32 %v293_v13 }
  0xbe   :  { %304 = vpow2.f32 %v294_v14 }
  0xc3   :  { %v303_v15 = vpop.eup %302 }
  0xc4   :  { %v305_v16 = vpop.eup %304  ;;  %v240_v17 = vadd.f32 1.0, %v303_v15 }
  0xc5   :  { %v241_v18 = vadd.f32 1.0, %v305_v16 }
  0xc6   :  { %306 = vrcp.f32 %v240_v17  ;;  %v253_v24 = vand.u32 2147483648, %v240_v17  ;;  %v251_v27 = vand.u32 2147483647, %v240_v17  ;;  %vm247_vm2 = vweird.f32 %v240_v17 }
  0xc7   :  { %308 = vrcp.f32 %v241_v18  ;;  %v268_v28 = vand.u32 2147483648, %v241_v18  ;;  %v266_v30 = vand.u32 2147483647, %v241_v18  ;;  %vm262_vm4 = vweird.f32 %v241_v18 }
  0xc8   :  { %v254_v32 = vor.u32 1.1754944e-38, %v253_v24  ;;  %vm252_vm5 = vcmp.eq.f32.partialorder %v251_v27, 8.507059e+37 }
  0xc9   :  { %v269_v35 = vor.u32 1.1754944e-38, %v268_v28  ;;  %vm267_vm7 = vcmp.eq.f32.partialorder %v266_v30, 8.507059e+37 }
  0xcc   :  { %v307_v19 = vpop.eup %306 }
  0xcd   :  { %v309_v20 = vpop.eup %308  ;;  %v243_v21 = vmul.f32 %v307_v19, %v240_v17  ;;  %vm248_vm0 = vweird.f32 %v307_v19 }
  0xce   :  { %v258_v22 = vmul.f32 %v309_v20, %v241_v18  ;;  %vm263_vm1 = vweird.f32 %v309_v20  ;;  %vm249_vm3 = vmor %vm247_vm2, %vm248_vm0 }
  0xcf   :  { %v244_v23 = vsub.f32 1.0, %v243_v21  ;;  %vm264_vm6 = vmor %vm262_vm4, %vm263_vm1 }
  0xd0   :  { %v259_v25 = vsub.f32 1.0, %v258_v22 }
  0xd1   :  { %v245_v26 = vmul.f32 %v307_v19, %v244_v23 }
  0xd2   :  { %v260_v29 = vmul.f32 %v309_v20, %v259_v25 }
  0xd3   :  { %v246_v31 = vadd.f32 %v307_v19, %v245_v26 }
  0xd4   :  { %v261_v33 = vadd.f32 %v309_v20, %v260_v29 }
  0xd5   :  { %v250_v34 = vsel %vm249_vm3, %v307_v19, %v246_v31 }
  0xd6   :  { %v255_v36 = vsel %vm252_vm5, %v254_v32, %v250_v34  ;;  %v265_v37 = vsel %vm264_vm6, %v309_v20, %v261_v33 }
  0xd7   :  { %v270_v38 = vsel %vm267_vm7, %v269_v35, %v265_v37  ;;  %272 = vst [vmem:[#allocation10] sm:$0xff] %v255_v36 }
  0xd8   :  { %273 = vst [vmem:[#allocation10 + $0x8] sm:$0xff] %v270_v38 }
  0xd9   :  { %284 = dma.vmem_to_hbm [thread:$0]  %s280_s13, 256, %s282_s16, [#allocation4]  }
  0xda   :  { %436 = dma.done.wait [#allocation4], 256  }
  0xdb   :  { %437 = vsyncadd [#allocation4], 4294967040 }
  0xdc   :  { %289 = vsyncpa [#allocation3], 1 }
  0xdd   :  { %290 = vsyncpa [#allocation6], 1 }
  0xde   :  { %291 = vsyncpa [#allocation9], 1 }
  0xdf   :  { %292 = vsyncpa [#allocation4], 1 }

</bundles_post_ra>
